<compile_context>
chip_gen: v5e
topology: v5e:2x2
jax: 0.10.0
libtpu: 0.0.40
codegen_flags: <defaults>
</compile_context>

<pallas_src>
import functools

import jax
import jax.numpy as jnp
import numpy as np
from jax import lax
from jax.experimental import pallas as pl
from jax.experimental.pallas import tpu as pltpu


def _round_up(v, m=8):
    return ((v + m - 1) // m) * m


# --------------------------------------------------------------------------------------
# Fused kernel: n_layers x (TransformerConv + Linear + ReLU) -> mean pool -> Linear(emb,1)
# --------------------------------------------------------------------------------------
def _fused_gnn_kernel(x_ref, edge_ref, wslab_ref, bslab_ref, o_ref, *,
                      n_layers, heads, emb):
    f32, bf16 = jnp.float32, jnp.bfloat16
    H, C = heads, emb
    HC = H * C
    W4 = 4 * HC
    L = n_layers

    N, fmax = x_ref.shape
    E = edge_ref.shape[0]
    De = edge_ref.shape[1] - 2 * N
    G = o_ref.shape[0]
    off_we = _round_up(fmax)          # row offsets inside each layer's weight block
    off_wt = off_we + _round_up(De)
    inv_sqrt_c = 1.0 / float(C) ** 0.5

    # ---- graph structure (single packed DMA): S/D one-hots + edge attributes ----------
    es = edge_ref[...]                         # [E, 2N + De] bf16
    S = es[:, 0:N]                             # [E, N] edge-source one-hot
    Dm = es[:, N:2 * N]                        # [E, N] edge-destination one-hot
    ea = es[:, 2 * N:2 * N + De]               # [E, De] edge attributes

    # ---- head-pool matrices built from iota (no HBM traffic, 0/1 -> bf16-exact) --------
    r = lax.broadcasted_iota(jnp.int32, (HC, H), 0)
    c = lax.broadcasted_iota(jnp.int32, (HC, H), 1)
    P = jnp.where((r >= c * C) & (r < (c + 1) * C), 1.0, 0.0).astype(bf16)    # [HC, H]
    r2 = lax.broadcasted_iota(jnp.int32, (H, HC), 0)
    c2 = lax.broadcasted_iota(jnp.int32, (H, HC), 1)
    Pt = jnp.where((c2 >= r2 * C) & (c2 < (r2 + 1) * C), 1.0, 0.0).astype(bf16)  # [H, HC]

    ball = bslab_ref[...]                      # [3L + 1 + G, 4*HC] f32 (biases/head/pool)

    h = x_ref[...]                             # [N, Fmax] f32, resident across layers

    for li in range(L):
        if h.shape[1] < fmax:                  # only needed when feat > emb
            h = jnp.concatenate(
                [h, jnp.zeros((N, fmax - h.shape[1]), f32)], axis=1)

        wli = wslab_ref[li]                    # [RW, 4*HC] bf16 (this layer's weights)
        wcat = wli[0:fmax, :]                  # [Fmax, 4*HC] = [wk | wv | wq | wskip]
        we2 = wli[off_we:off_we + De, 0:2 * HC]     # [De, 2*HC] = [we | we]
        wt = wli[off_wt:off_wt + HC, 0:C]           # [HC, C]

        bcat = ball[3 * li + 0:3 * li + 1, :]       # [1, 4*HC] = [bk | bv | bq | bskip]
        wab = ball[3 * li + 1:3 * li + 2, :]
        wba = wab[:, 0:HC]                          # beta weights applied to `out`
        wbb = wab[:, HC:2 * HC]                     # beta weights applied to `x_r`
        bt = ball[3 * li + 2:3 * li + 3, 0:C]       # [1, C]

        # Fused projections: x @ [wk | wv | wq | wskip] -> [N, 4*HC] (256 lanes wide)
        hb = h.astype(bf16)
        proj = jnp.dot(hb, wcat, preferred_element_type=f32) + bcat     # [N, 4*HC]
        kv = proj[:, 0:2 * HC]                 # lanes 0:128 (k | v), vreg-tile aligned
        q = proj[:, 2 * HC:3 * HC]             # [N, HC]
        x_r = proj[:, 3 * HC:4 * HC]           # [N, HC] (lin_skip)

        # Edge-attribute projection, duplicated so it adds onto both k and v lanes.
        e2 = jnp.dot(ea, we2, preferred_element_type=f32)               # [E, 2*HC]

        # Gathers via one-hot matmuls: one S pass for (k, v), one D pass for q.
        kv_j = jnp.dot(S, kv.astype(bf16), preferred_element_type=f32) + e2   # [E, 2*HC]
        k_j = kv_j[:, 0:HC]
        v_j = kv_j[:, HC:2 * HC]
        q_i = jnp.dot(Dm, q.astype(bf16), preferred_element_type=f32)         # [E, HC]

        # Per-head attention logits: sum over the C channels of each head.
        logits = jnp.dot((q_i * k_j).astype(bf16), P,
                         preferred_element_type=f32) * inv_sqrt_c             # [E, H]

        # Softmax over edges grouped by destination node (global per-head max is
        # numerically sufficient; normalization makes it identical to segment max).
        m = jnp.max(logits, axis=0, keepdims=True)                            # [1, H]
        p = jnp.exp(logits - m)                                               # [E, H]
        p_full = jnp.dot(p.astype(bf16), Pt, preferred_element_type=f32)      # [E, HC]
        msg = v_j * p_full                                                    # [E, HC]

        # Single D^T scatter pass for (un-normalized messages | softmax denominators).
        scat_in = jnp.concatenate([msg, p], axis=1).astype(bf16)              # [E, HC+H]
        scattered = lax.dot_general(Dm, scat_in, (((0,), (0,)), ((), ())),
                                    preferred_element_type=f32)               # [N, HC+H]
        out_un = scattered[:, 0:HC]
        denom = scattered[:, HC:HC + H]

        # Normalize after the scatter; guard isolated nodes (denom == 0 -> out = 0).
        inv_d = jnp.where(denom > 0.0, 1.0 / denom, 0.0)                      # exact recip
        out = out_un * jnp.dot(inv_d.astype(bf16), Pt,
                               preferred_element_type=f32)                    # [N, HC]

        # Beta skip connection, algebraically folded:
        #   lin_beta([out, x_r, out - x_r]) = out @ (wb1+wb3) + x_r @ (wb2-wb3)
        beta_logit = jnp.sum(out * wba + x_r * wbb, axis=1, keepdims=True)    # [N, 1]
        beta = jax.nn.sigmoid(beta_logit)
        conv_out = beta * x_r + (1.0 - beta) * out                            # [N, HC]

        # Trailing Linear(HC -> C) + ReLU of the model.
        h = jnp.maximum(
            jnp.dot(conv_out.astype(bf16), wt,
                    preferred_element_type=f32) + bt, 0.0)                    # [N, C]

    # global_mean_pool + final Linear(C, 1) as VPU multiply + lane reduce.
    Bnorm = ball[3 * L + 1:3 * L + 1 + G, 0:N].astype(bf16)                   # [G, N]
    head = ball[3 * L:3 * L + 1, :]                                           # [1, 4*HC]
    wl_row = head[:, 0:C]                                                     # [1, C]
    bl_val = head[:, C:C + 1]                                                 # [1, 1]
    pooled = jnp.dot(Bnorm, h.astype(bf16), preferred_element_type=f32)       # [G, C]
    o_ref[...] = jnp.sum(pooled * wl_row, axis=1, keepdims=True) + bl_val     # [G, 1]


# --------------------------------------------------------------------------------------
# Host wrapper: pack slabs (4 inputs total) and call the fused kernel.
# --------------------------------------------------------------------------------------
def pallas_forward(layers, wl, bl, x, edge_attr, edge_index, batch, num_graphs, heads, emb):
    f32, bf16 = jnp.float32, jnp.bfloat16
    N, feat = x.shape
    E, De = edge_attr.shape
    H, C = heads, emb
    HC = H * C
    W4 = 4 * HC
    L = len(layers)
    Fmax = max(feat, C)
    off_we = _round_up(Fmax)
    off_wt = off_we + _round_up(De)

    def pad_lanes(w, width):
        if w.shape[1] < width:
            return jnp.concatenate(
                [w, jnp.zeros((w.shape[0], width - w.shape[1]), w.dtype)], axis=1)
        return w

    def pad_rows(w, rows):
        if w.shape[0] < rows:
            return jnp.concatenate(
                [w, jnp.zeros((rows - w.shape[0], w.shape[1]), w.dtype)], axis=0)
        return w

    # 1) node features, Fin padded to Fmax
    x_pad = pad_lanes(x.astype(f32), Fmax)                                    # [N, Fmax]

    # 2) graph-structure slab: [ S | D | edge_attr ]  (0/1 one-hots -> bf16-exact)
    S = jax.nn.one_hot(edge_index[0], N, dtype=f32)                           # [E, N]
    Dm = jax.nn.one_hot(edge_index[1], N, dtype=f32)                          # [E, N]
    edge_slab = jnp.concatenate([S, Dm, edge_attr.astype(f32)],
                                axis=1).astype(bf16)                          # [E, 2N+De]

    # 3) bf16 weight slab [L, RW, 4*HC]: rows 0:Fmax = [wk|wv|wq|wskip],
    #    rows off_we:+De = [we|we], rows off_wt:+HC = wt (all sub-blocks 8-row aligned).
    wblocks = []
    for prm in layers:
        wcat = jnp.concatenate([prm["wk"], prm["wv"], prm["wq"], prm["wskip"]], axis=1)
        wcat = pad_rows(wcat, off_we)                                         # [off_we, 4HC]
        we2 = pad_rows(pad_lanes(jnp.concatenate([prm["we"], prm["we"]], axis=1), W4),
                       off_wt - off_we)                                       # [ , 4HC]
        wt = pad_lanes(prm["wt"], W4)                                         # [HC, 4HC]
        wblocks.append(jnp.concatenate([wcat, we2, wt], axis=0))
    wslab = jnp.stack(wblocks, axis=0).astype(bf16)                           # [L, RW, 4HC]

    # 4) f32 bias/constants slab [3L+1+G, 4*HC]:
    #    rows 3li+{0,1,2}: [bk|bv|bq|bskip], [wba|wbb], bt ; row 3L: [wl|bl] ; rows 3L+1..: Bnorm
    brows = []
    for prm in layers:
        bcat = jnp.concatenate([prm["bk"], prm["bv"], prm["bq"], prm["bskip"]], axis=1)
        wab = pad_lanes(jnp.concatenate([(prm["wb1"] + prm["wb3"]).T,
                                         (prm["wb2"] - prm["wb3"]).T], axis=1), W4)
        brows += [bcat, wab, pad_lanes(prm["bt"], W4)]
    brows.append(pad_lanes(jnp.concatenate([wl.T, bl], axis=1), W4))          # head row
    Bm = jax.nn.one_hot(batch, num_graphs, dtype=f32).T                       # [G, N]
    Bnorm = Bm / jnp.maximum(jnp.sum(Bm, axis=1, keepdims=True), 1.0)
    brows.append(pad_lanes(Bnorm, W4))
    bslab = jnp.concatenate(brows, axis=0)                                    # [3L+1+G, 4HC]

    kernel = functools.partial(_fused_gnn_kernel, n_layers=L, heads=heads, emb=emb)

    return pl.pallas_call(
        kernel,
        out_shape=jax.ShapeDtypeStruct((num_graphs, 1), f32),
        in_specs=[pl.BlockSpec(memory_space=pltpu.MemorySpace.VMEM)] * 4,
        out_specs=pl.BlockSpec(memory_space=pltpu.MemorySpace.VMEM),
        compiler_params=pltpu.CompilerParams(vmem_limit_bytes=32 * 1024 * 1024),
    )(x_pad, edge_slab, wslab, bslab)


# --------------------------------------------------------------------------------------
# Parameters (deterministic, PyTorch-Linear-like uniform init)
# --------------------------------------------------------------------------------------
def init_params(key, feat, edge_dim, emb, heads, n_layers):
    hc = emb * heads

    def linear(k, fan_in, fan_out, bias=True):
        k1, k2 = jax.random.split(k)
        bound = 1.0 / np.sqrt(fan_in)
        w = jax.random.uniform(k1, (fan_in, fan_out), jnp.float32, -bound, bound)
        b = (jax.random.uniform(k2, (1, fan_out), jnp.float32, -bound, bound)
             if bias else None)
        return w, b

    layers = []
    in_dim = feat
    for li in range(n_layers):
        keys = jax.random.split(jax.random.fold_in(key, li), 7)
        wq, bq = linear(keys[0], in_dim, hc)
        wk, bk = linear(keys[1], in_dim, hc)
        wv, bv = linear(keys[2], in_dim, hc)
        we, _ = linear(keys[3], edge_dim, hc, bias=False)
        wskip, bskip = linear(keys[4], in_dim, hc)
        wbeta, _ = linear(keys[5], 3 * hc, 1, bias=False)
        wt, bt = linear(keys[6], hc, emb)
        layers.append(dict(wq=wq, bq=bq, wk=wk, bk=bk, wv=wv, bv=bv, we=we,
                           wskip=wskip, bskip=bskip,
                           wb1=wbeta[:hc], wb2=wbeta[hc:2 * hc], wb3=wbeta[2 * hc:],
                           wt=wt, bt=bt))
        in_dim = emb
    wl, bl = linear(jax.random.fold_in(key, 999), emb, 1)
    return layers, wl, bl


# --------------------------------------------------------------------------------------
# Pure-JAX reference (f32, scatter/gather semantics identical to the PyTorch module)
# --------------------------------------------------------------------------------------
def reference_forward(layers, wl, bl, x, edge_attr, edge_index, batch, num_graphs, heads, emb):
    H, C = heads, emb
    HC = H * C
    src, dst = edge_index[0], edge_index[1]
    N = x.shape[0]
    h = x
    for prm in layers:
        q = (h @ prm["wq"] + prm["bq"]).reshape(N, H, C)
        k = (h @ prm["wk"] + prm["bk"]).reshape(N, H, C)
        v = (h @ prm["wv"] + prm["bv"]).reshape(N, H, C)
        e = (edge_attr @ prm["we"]).reshape(-1, H, C)
        k_j = k[src] + e
        v_j = v[src] + e
        q_i = q[dst]
        logits = (q_i * k_j).sum(-1) / np.sqrt(C)                        # [E, H]
        m = jnp.full((N, H), -jnp.inf).at[dst].max(logits)
        p = jnp.exp(logits - m[dst])
        denom = jnp.zeros((N, H)).at[dst].add(p)
        alpha = p / denom[dst]
        out = jnp.zeros((N, H, C)).at[dst].add(v_j * alpha[..., None]).reshape(N, HC)
        x_r = h @ prm["wskip"] + prm["bskip"]
        beta = jax.nn.sigmoid(out @ prm["wb1"] + x_r @ prm["wb2"]
                              + (out - x_r) @ prm["wb3"])
        conv = beta * x_r + (1.0 - beta) * out
        h = jax.nn.relu(conv @ prm["wt"] + prm["bt"])
    cnt = jnp.zeros((num_graphs,)).at[batch].add(1.0)
    pooled = jnp.zeros((num_graphs, emb)).at[batch].add(h) / cnt[:, None]
    return pooled @ wl + bl


# --------------------------------------------------------------------------------------
if __name__ == "__main__":
    key = jax.random.PRNGKey(0)

    model_params = dict(MODEL_FEAT_SIZE=8, MODEL_EDGE_DIM=4, MODEL_EMBEDDING_SIZE=16,
                        MODEL_NUM_LAYERS=2, MODEL_DROPOUT_RATE=0.1, MODEL_NUM_HEADS=4)
    FEAT = model_params["MODEL_FEAT_SIZE"]
    EDGE_DIM = model_params["MODEL_EDGE_DIM"]
    EMB = model_params["MODEL_EMBEDDING_SIZE"]
    N_LAYERS = model_params["MODEL_NUM_LAYERS"]
    HEADS = model_params["MODEL_NUM_HEADS"]

    N, E, G = 8, 16, 2  # 2 graphs of 4 nodes each, 8 edges per graph

    kx, ke, ks0, kd0, ks1, kd1, kp = jax.random.split(key, 7)
    x = jax.random.normal(kx, (N, FEAT), jnp.float32)
    edge_attr = jax.random.normal(ke, (E, EDGE_DIM), jnp.float32)
    src0 = jax.random.randint(ks0, (E // 2,), 0, 4)
    dst0 = jax.random.randint(kd0, (E // 2,), 0, 4)
    src1 = jax.random.randint(ks1, (E // 2,), 0, 4) + 4
    dst1 = jax.random.randint(kd1, (E // 2,), 0, 4) + 4
    edge_index = jnp.stack([jnp.concatenate([src0, src1]),
                            jnp.concatenate([dst0, dst1])], axis=0)      # [2, E]
    batch = jnp.array([0, 0, 0, 0, 1, 1, 1, 1], dtype=jnp.int32)

    layers, wl, bl = init_params(kp, FEAT, EDGE_DIM, EMB, HEADS, N_LAYERS)

    out = pallas_forward(layers, wl, bl, x, edge_attr, edge_index, batch, G, HEADS, EMB)
    out = jax.block_until_ready(out)

    ref = reference_forward(layers, wl, bl, x, edge_attr, edge_index, batch, G, HEADS, EMB)
    ref = jax.block_until_ready(ref)

    assert out.shape == (G, 1)
    # bf16 MXU inputs introduce ~1e-3 relative error per matmul; tolerance reflects that.
    np.testing.assert_allclose(np.asarray(out), np.asarray(ref), atol=2e-2, rtol=2e-2)
    print("KERNEL_OK")
</pallas_src>

<mosaic_0001>
module attributes {stable_mosaic.version = 11 : i64} {
  func.func @_fused_gnn_kernel(%arg0: memref<8x16xf32, #tpu.memory_space<vmem>>, %arg1: memref<16x20xbf16, #tpu.memory_space<vmem>>, %arg2: memref<2x88x256xbf16, #tpu.memory_space<vmem>>, %arg3: memref<9x256xf32, #tpu.memory_space<vmem>>, %arg4: memref<2x1xf32, #tpu.memory_space<vmem>>) attributes {dimension_semantics = [], scalar_prefetch = 0 : i64, scratch_operands = 0 : i64, tpu.core_type = #tpu.core_type<tc>} {
    %c0 = arith.constant 0 : index
    %c0_0 = arith.constant 0 : index
    %0 = vector.load %arg1[%c0, %c0_0] : memref<16x20xbf16, #tpu.memory_space<vmem>>, vector<16x20xbf16>
    %1 = vector.extract_strided_slice %0 {offsets = [0, 0], sizes = [16, 8], strides = [1, 1]} : vector<16x20xbf16> to vector<16x8xbf16>
    %2 = vector.extract_strided_slice %0 {offsets = [0, 8], sizes = [16, 8], strides = [1, 1]} : vector<16x20xbf16> to vector<16x8xbf16>
    %3 = vector.extract_strided_slice %0 {offsets = [0, 16], sizes = [16, 4], strides = [1, 1]} : vector<16x20xbf16> to vector<16x4xbf16>
    %4 = tpu.iota {dimensions = array<i32: 0>} : vector<64x4xi32>
    %5 = tpu.iota {dimensions = array<i32: 1>} : vector<64x4xi32>
    %c16_i32 = arith.constant 16 : i32
    %6 = vector.broadcast %c16_i32 : i32 to vector<64x4xi32>
    %7 = arith.muli %5, %6 : vector<64x4xi32>
    %8 = arith.cmpi sge, %4, %7 : vector<64x4xi32>
    %c1_i32 = arith.constant 1 : i32
    %9 = vector.broadcast %c1_i32 : i32 to vector<64x4xi32>
    %10 = arith.addi %5, %9 : vector<64x4xi32>
    %c16_i32_1 = arith.constant 16 : i32
    %11 = vector.broadcast %c16_i32_1 : i32 to vector<64x4xi32>
    %12 = arith.muli %10, %11 : vector<64x4xi32>
    %13 = arith.cmpi slt, %4, %12 : vector<64x4xi32>
    %14 = arith.andi %8, %13 : vector<64x4xi1>
    %cst = arith.constant 1.000000e+00 : f32
    %cst_2 = arith.constant 0.000000e+00 : f32
    %15 = vector.broadcast %cst : f32 to vector<64x4xf32>
    %16 = vector.broadcast %cst_2 : f32 to vector<64x4xf32>
    %17 = arith.select %14, %15, %16 : vector<64x4xi1>, vector<64x4xf32>
    %18 = arith.truncf %17 : vector<64x4xf32> to vector<64x4xbf16>
    %19 = tpu.iota {dimensions = array<i32: 0>} : vector<4x64xi32>
    %20 = tpu.iota {dimensions = array<i32: 1>} : vector<4x64xi32>
    %c16_i32_3 = arith.constant 16 : i32
    %21 = vector.broadcast %c16_i32_3 : i32 to vector<4x64xi32>
    %22 = arith.muli %19, %21 : vector<4x64xi32>
    %23 = arith.cmpi sge, %20, %22 : vector<4x64xi32>
    %c1_i32_4 = arith.constant 1 : i32
    %24 = vector.broadcast %c1_i32_4 : i32 to vector<4x64xi32>
    %25 = arith.addi %19, %24 : vector<4x64xi32>
    %c16_i32_5 = arith.constant 16 : i32
    %26 = vector.broadcast %c16_i32_5 : i32 to vector<4x64xi32>
    %27 = arith.muli %25, %26 : vector<4x64xi32>
    %28 = arith.cmpi slt, %20, %27 : vector<4x64xi32>
    %29 = arith.andi %23, %28 : vector<4x64xi1>
    %cst_6 = arith.constant 1.000000e+00 : f32
    %cst_7 = arith.constant 0.000000e+00 : f32
    %30 = vector.broadcast %cst_6 : f32 to vector<4x64xf32>
    %31 = vector.broadcast %cst_7 : f32 to vector<4x64xf32>
    %32 = arith.select %29, %30, %31 : vector<4x64xi1>, vector<4x64xf32>
    %33 = arith.truncf %32 : vector<4x64xf32> to vector<4x64xbf16>
    %c0_8 = arith.constant 0 : index
    %c0_9 = arith.constant 0 : index
    %34 = vector.load %arg3[%c0_8, %c0_9] : memref<9x256xf32, #tpu.memory_space<vmem>>, vector<9x256xf32>
    %c0_10 = arith.constant 0 : index
    %c0_11 = arith.constant 0 : index
    %35 = vector.load %arg0[%c0_10, %c0_11] : memref<8x16xf32, #tpu.memory_space<vmem>>, vector<8x16xf32>
    %c0_12 = arith.constant 0 : index
    %c0_13 = arith.constant 0 : index
    %c0_14 = arith.constant 0 : index
    %36 = vector.load %arg2[%c0_12, %c0_13, %c0_14] : memref<2x88x256xbf16, #tpu.memory_space<vmem>>, vector<1x88x256xbf16>
    %37 = vector.shape_cast %36 : vector<1x88x256xbf16> to vector<88x256xbf16>
    %38 = vector.extract_strided_slice %37 {offsets = [0, 0], sizes = [16, 256], strides = [1, 1]} : vector<88x256xbf16> to vector<16x256xbf16>
    %39 = vector.extract_strided_slice %37 {offsets = [16, 0], sizes = [4, 128], strides = [1, 1]} : vector<88x256xbf16> to vector<4x128xbf16>
    %40 = vector.extract_strided_slice %37 {offsets = [24, 0], sizes = [64, 16], strides = [1, 1]} : vector<88x256xbf16> to vector<64x16xbf16>
    %41 = vector.extract_strided_slice %34 {offsets = [0, 0], sizes = [1, 256], strides = [1, 1]} : vector<9x256xf32> to vector<1x256xf32>
    %42 = vector.extract_strided_slice %34 {offsets = [1, 0], sizes = [1, 256], strides = [1, 1]} : vector<9x256xf32> to vector<1x256xf32>
    %43 = vector.extract_strided_slice %42 {offsets = [0, 0], sizes = [1, 64], strides = [1, 1]} : vector<1x256xf32> to vector<1x64xf32>
    %44 = vector.extract_strided_slice %42 {offsets = [0, 64], sizes = [1, 64], strides = [1, 1]} : vector<1x256xf32> to vector<1x64xf32>
    %45 = vector.extract_strided_slice %34 {offsets = [2, 0], sizes = [1, 16], strides = [1, 1]} : vector<9x256xf32> to vector<1x16xf32>
    %46 = arith.truncf %35 : vector<8x16xf32> to vector<8x16xbf16>
    %cst_15 = arith.constant dense<0.000000e+00> : vector<8x256xf32>
    %47 = tpu.matmul %46, %38, %cst_15 {dimension_numbers = #tpu.dot_dimension_numbers<[1], [0], [0], [1], [0, 0, 1, 1], [], []>} : vector<8x16xbf16>, vector<16x256xbf16>, vector<8x256xf32> -> vector<8x256xf32>
    %48 = vector.broadcast %41 : vector<1x256xf32> to vector<8x256xf32>
    %49 = arith.addf %47, %48 : vector<8x256xf32>
    %50 = vector.extract_strided_slice %49 {offsets = [0, 0], sizes = [8, 128], strides = [1, 1]} : vector<8x256xf32> to vector<8x128xf32>
    %51 = vector.extract_strided_slice %49 {offsets = [0, 128], sizes = [8, 64], strides = [1, 1]} : vector<8x256xf32> to vector<8x64xf32>
    %52 = vector.extract_strided_slice %49 {offsets = [0, 192], sizes = [8, 64], strides = [1, 1]} : vector<8x256xf32> to vector<8x64xf32>
    %cst_16 = arith.constant dense<0.000000e+00> : vector<16x128xf32>
    %53 = tpu.matmul %3, %39, %cst_16 {dimension_numbers = #tpu.dot_dimension_numbers<[1], [0], [0], [1], [0, 0, 1, 1], [], []>} : vector<16x4xbf16>, vector<4x128xbf16>, vector<16x128xf32> -> vector<16x128xf32>
    %54 = arith.truncf %50 : vector<8x128xf32> to vector<8x128xbf16>
    %cst_17 = arith.constant dense<0.000000e+00> : vector<16x128xf32>
    %55 = tpu.matmul %1, %54, %cst_17 {dimension_numbers = #tpu.dot_dimension_numbers<[1], [0], [0], [1], [0, 0, 1, 1], [], []>} : vector<16x8xbf16>, vector<8x128xbf16>, vector<16x128xf32> -> vector<16x128xf32>
    %56 = arith.addf %55, %53 : vector<16x128xf32>
    %57 = vector.extract_strided_slice %56 {offsets = [0, 0], sizes = [16, 64], strides = [1, 1]} : vector<16x128xf32> to vector<16x64xf32>
    %58 = vector.extract_strided_slice %56 {offsets = [0, 64], sizes = [16, 64], strides = [1, 1]} : vector<16x128xf32> to vector<16x64xf32>
    %59 = arith.truncf %51 : vector<8x64xf32> to vector<8x64xbf16>
    %cst_18 = arith.constant dense<0.000000e+00> : vector<16x64xf32>
    %60 = tpu.matmul %2, %59, %cst_18 {dimension_numbers = #tpu.dot_dimension_numbers<[1], [0], [0], [1], [0, 0, 1, 1], [], []>} : vector<16x8xbf16>, vector<8x64xbf16>, vector<16x64xf32> -> vector<16x64xf32>
    %61 = arith.mulf %60, %57 : vector<16x64xf32>
    %62 = arith.truncf %61 : vector<16x64xf32> to vector<16x64xbf16>
    %cst_19 = arith.constant dense<0.000000e+00> : vector<16x4xf32>
    %63 = tpu.matmul %62, %18, %cst_19 {dimension_numbers = #tpu.dot_dimension_numbers<[1], [0], [0], [1], [0, 0, 1, 1], [], []>} : vector<16x64xbf16>, vector<64x4xbf16>, vector<16x4xf32> -> vector<16x4xf32>
    %cst_20 = arith.constant 2.500000e-01 : f32
    %64 = vector.broadcast %cst_20 : f32 to vector<16x4xf32>
    %65 = arith.mulf %63, %64 : vector<16x4xf32>
    %cst_21 = arith.constant dense<0xFF800000> : vector<4xf32>
    %66 = vector.multi_reduction <maximumf>, %65, %cst_21 [0] : vector<16x4xf32> to vector<4xf32>
    %67 = vector.shape_cast %66 : vector<4xf32> to vector<1x4xf32>
    %68 = vector.broadcast %67 : vector<1x4xf32> to vector<16x4xf32>
    %69 = arith.subf %65, %68 : vector<16x4xf32>
    %70 = math.exp %69 : vector<16x4xf32>
    %71 = arith.truncf %70 : vector<16x4xf32> to vector<16x4xbf16>
    %cst_22 = arith.constant dense<0.000000e+00> : vector<16x64xf32>
    %72 = tpu.matmul %71, %33, %cst_22 {dimension_numbers = #tpu.dot_dimension_numbers<[1], [0], [0], [1], [0, 0, 1, 1], [], []>} : vector<16x4xbf16>, vector<4x64xbf16>, vector<16x64xf32> -> vector<16x64xf32>
    %73 = arith.mulf %58, %72 : vector<16x64xf32>
    %74 = tpu.concatenate %73, %70 in 1 : vector<16x64xf32>, vector<16x4xf32> -> vector<16x68xf32>
    %75 = arith.truncf %74 : vector<16x68xf32> to vector<16x68xbf16>
    %cst_23 = arith.constant dense<0.000000e+00> : vector<8x68xf32>
    %76 = tpu.matmul %2, %75, %cst_23 {dimension_numbers = #tpu.dot_dimension_numbers<[0], [0], [1], [1], [0, 1, 1, 1], [], []>} : vector<16x8xbf16>, vector<16x68xbf16>, vector<8x68xf32> -> vector<8x68xf32>
    %77 = vector.extract_strided_slice %76 {offsets = [0, 0], sizes = [8, 64], strides = [1, 1]} : vector<8x68xf32> to vector<8x64xf32>
    %78 = vector.extract_strided_slice %76 {offsets = [0, 64], sizes = [8, 4], strides = [1, 1]} : vector<8x68xf32> to vector<8x4xf32>
    %cst_24 = arith.constant 0.000000e+00 : f32
    %79 = vector.broadcast %cst_24 : f32 to vector<8x4xf32>
    %80 = arith.cmpf ogt, %78, %79 : vector<8x4xf32>
    %cst_25 = arith.constant 1.000000e+00 : f32
    %81 = vector.broadcast %cst_25 : f32 to vector<8x4xf32>
    %82 = arith.divf %81, %78 : vector<8x4xf32>
    %cst_26 = arith.constant 0.000000e+00 : f32
    %83 = vector.broadcast %cst_26 : f32 to vector<8x4xf32>
    %84 = arith.select %80, %82, %83 : vector<8x4xi1>, vector<8x4xf32>
    %85 = arith.truncf %84 : vector<8x4xf32> to vector<8x4xbf16>
    %cst_27 = arith.constant dense<0.000000e+00> : vector<8x64xf32>
    %86 = tpu.matmul %85, %33, %cst_27 {dimension_numbers = #tpu.dot_dimension_numbers<[1], [0], [0], [1], [0, 0, 1, 1], [], []>} : vector<8x4xbf16>, vector<4x64xbf16>, vector<8x64xf32> -> vector<8x64xf32>
    %87 = arith.mulf %77, %86 : vector<8x64xf32>
    %88 = vector.broadcast %43 : vector<1x64xf32> to vector<8x64xf32>
    %89 = arith.mulf %87, %88 : vector<8x64xf32>
    %90 = vector.broadcast %44 : vector<1x64xf32> to vector<8x64xf32>
    %91 = arith.mulf %52, %90 : vector<8x64xf32>
    %92 = arith.addf %89, %91 : vector<8x64xf32>
    %cst_28 = arith.constant dense<0.000000e+00> : vector<8xf32>
    %93 = vector.multi_reduction <add>, %92, %cst_28 [1] : vector<8x64xf32> to vector<8xf32>
    %94 = vector.shape_cast %93 : vector<8xf32> to vector<8x1xf32>
    %95 = arith.negf %94 : vector<8x1xf32>
    %96 = math.exp %95 : vector<8x1xf32>
    %cst_29 = arith.constant 1.000000e+00 : f32
    %97 = vector.broadcast %cst_29 : f32 to vector<8x1xf32>
    %98 = arith.addf %97, %96 : vector<8x1xf32>
    %99 = arith.divf %97, %98 : vector<8x1xf32>
    %100 = vector.broadcast %99 : vector<8x1xf32> to vector<8x64xf32>
    %101 = arith.mulf %100, %52 : vector<8x64xf32>
    %cst_30 = arith.constant 1.000000e+00 : f32
    %102 = vector.broadcast %cst_30 : f32 to vector<8x1xf32>
    %103 = arith.subf %102, %99 : vector<8x1xf32>
    %104 = vector.broadcast %103 : vector<8x1xf32> to vector<8x64xf32>
    %105 = arith.mulf %104, %87 : vector<8x64xf32>
    %106 = arith.addf %101, %105 : vector<8x64xf32>
    %107 = arith.truncf %106 : vector<8x64xf32> to vector<8x64xbf16>
    %cst_31 = arith.constant dense<0.000000e+00> : vector<8x16xf32>
    %108 = tpu.matmul %107, %40, %cst_31 {dimension_numbers = #tpu.dot_dimension_numbers<[1], [0], [0], [1], [0, 0, 1, 1], [], []>} : vector<8x64xbf16>, vector<64x16xbf16>, vector<8x16xf32> -> vector<8x16xf32>
    %109 = vector.broadcast %45 : vector<1x16xf32> to vector<8x16xf32>
    %110 = arith.addf %108, %109 : vector<8x16xf32>
    %cst_32 = arith.constant 0.000000e+00 : f32
    %111 = vector.broadcast %cst_32 : f32 to vector<8x16xf32>
    %112 = arith.maximumf %110, %111 : vector<8x16xf32>
    %c1 = arith.constant 1 : index
    %c0_33 = arith.constant 0 : index
    %c0_34 = arith.constant 0 : index
    %113 = vector.load %arg2[%c1, %c0_33, %c0_34] : memref<2x88x256xbf16, #tpu.memory_space<vmem>>, vector<1x88x256xbf16>
    %114 = vector.shape_cast %113 : vector<1x88x256xbf16> to vector<88x256xbf16>
    %115 = vector.extract_strided_slice %114 {offsets = [0, 0], sizes = [16, 256], strides = [1, 1]} : vector<88x256xbf16> to vector<16x256xbf16>
    %116 = vector.extract_strided_slice %114 {offsets = [16, 0], sizes = [4, 128], strides = [1, 1]} : vector<88x256xbf16> to vector<4x128xbf16>
    %117 = vector.extract_strided_slice %114 {offsets = [24, 0], sizes = [64, 16], strides = [1, 1]} : vector<88x256xbf16> to vector<64x16xbf16>
    %118 = vector.extract_strided_slice %34 {offsets = [3, 0], sizes = [1, 256], strides = [1, 1]} : vector<9x256xf32> to vector<1x256xf32>
    %119 = vector.extract_strided_slice %34 {offsets = [4, 0], sizes = [1, 256], strides = [1, 1]} : vector<9x256xf32> to vector<1x256xf32>
    %120 = vector.extract_strided_slice %119 {offsets = [0, 0], sizes = [1, 64], strides = [1, 1]} : vector<1x256xf32> to vector<1x64xf32>
    %121 = vector.extract_strided_slice %119 {offsets = [0, 64], sizes = [1, 64], strides = [1, 1]} : vector<1x256xf32> to vector<1x64xf32>
    %122 = vector.extract_strided_slice %34 {offsets = [5, 0], sizes = [1, 16], strides = [1, 1]} : vector<9x256xf32> to vector<1x16xf32>
    %123 = arith.truncf %112 : vector<8x16xf32> to vector<8x16xbf16>
    %cst_35 = arith.constant dense<0.000000e+00> : vector<8x256xf32>
    %124 = tpu.matmul %123, %115, %cst_35 {dimension_numbers = #tpu.dot_dimension_numbers<[1], [0], [0], [1], [0, 0, 1, 1], [], []>} : vector<8x16xbf16>, vector<16x256xbf16>, vector<8x256xf32> -> vector<8x256xf32>
    %125 = vector.broadcast %118 : vector<1x256xf32> to vector<8x256xf32>
    %126 = arith.addf %124, %125 : vector<8x256xf32>
    %127 = vector.extract_strided_slice %126 {offsets = [0, 0], sizes = [8, 128], strides = [1, 1]} : vector<8x256xf32> to vector<8x128xf32>
    %128 = vector.extract_strided_slice %126 {offsets = [0, 128], sizes = [8, 64], strides = [1, 1]} : vector<8x256xf32> to vector<8x64xf32>
    %129 = vector.extract_strided_slice %126 {offsets = [0, 192], sizes = [8, 64], strides = [1, 1]} : vector<8x256xf32> to vector<8x64xf32>
    %cst_36 = arith.constant dense<0.000000e+00> : vector<16x128xf32>
    %130 = tpu.matmul %3, %116, %cst_36 {dimension_numbers = #tpu.dot_dimension_numbers<[1], [0], [0], [1], [0, 0, 1, 1], [], []>} : vector<16x4xbf16>, vector<4x128xbf16>, vector<16x128xf32> -> vector<16x128xf32>
    %131 = arith.truncf %127 : vector<8x128xf32> to vector<8x128xbf16>
    %cst_37 = arith.constant dense<0.000000e+00> : vector<16x128xf32>
    %132 = tpu.matmul %1, %131, %cst_37 {dimension_numbers = #tpu.dot_dimension_numbers<[1], [0], [0], [1], [0, 0, 1, 1], [], []>} : vector<16x8xbf16>, vector<8x128xbf16>, vector<16x128xf32> -> vector<16x128xf32>
    %133 = arith.addf %132, %130 : vector<16x128xf32>
    %134 = vector.extract_strided_slice %133 {offsets = [0, 0], sizes = [16, 64], strides = [1, 1]} : vector<16x128xf32> to vector<16x64xf32>
    %135 = vector.extract_strided_slice %133 {offsets = [0, 64], sizes = [16, 64], strides = [1, 1]} : vector<16x128xf32> to vector<16x64xf32>
    %136 = arith.truncf %128 : vector<8x64xf32> to vector<8x64xbf16>
    %cst_38 = arith.constant dense<0.000000e+00> : vector<16x64xf32>
    %137 = tpu.matmul %2, %136, %cst_38 {dimension_numbers = #tpu.dot_dimension_numbers<[1], [0], [0], [1], [0, 0, 1, 1], [], []>} : vector<16x8xbf16>, vector<8x64xbf16>, vector<16x64xf32> -> vector<16x64xf32>
    %138 = arith.mulf %137, %134 : vector<16x64xf32>
    %139 = arith.truncf %138 : vector<16x64xf32> to vector<16x64xbf16>
    %cst_39 = arith.constant dense<0.000000e+00> : vector<16x4xf32>
    %140 = tpu.matmul %139, %18, %cst_39 {dimension_numbers = #tpu.dot_dimension_numbers<[1], [0], [0], [1], [0, 0, 1, 1], [], []>} : vector<16x64xbf16>, vector<64x4xbf16>, vector<16x4xf32> -> vector<16x4xf32>
    %cst_40 = arith.constant 2.500000e-01 : f32
    %141 = vector.broadcast %cst_40 : f32 to vector<16x4xf32>
    %142 = arith.mulf %140, %141 : vector<16x4xf32>
    %cst_41 = arith.constant dense<0xFF800000> : vector<4xf32>
    %143 = vector.multi_reduction <maximumf>, %142, %cst_41 [0] : vector<16x4xf32> to vector<4xf32>
    %144 = vector.shape_cast %143 : vector<4xf32> to vector<1x4xf32>
    %145 = vector.broadcast %144 : vector<1x4xf32> to vector<16x4xf32>
    %146 = arith.subf %142, %145 : vector<16x4xf32>
    %147 = math.exp %146 : vector<16x4xf32>
    %148 = arith.truncf %147 : vector<16x4xf32> to vector<16x4xbf16>
    %cst_42 = arith.constant dense<0.000000e+00> : vector<16x64xf32>
    %149 = tpu.matmul %148, %33, %cst_42 {dimension_numbers = #tpu.dot_dimension_numbers<[1], [0], [0], [1], [0, 0, 1, 1], [], []>} : vector<16x4xbf16>, vector<4x64xbf16>, vector<16x64xf32> -> vector<16x64xf32>
    %150 = arith.mulf %135, %149 : vector<16x64xf32>
    %151 = tpu.concatenate %150, %147 in 1 : vector<16x64xf32>, vector<16x4xf32> -> vector<16x68xf32>
    %152 = arith.truncf %151 : vector<16x68xf32> to vector<16x68xbf16>
    %cst_43 = arith.constant dense<0.000000e+00> : vector<8x68xf32>
    %153 = tpu.matmul %2, %152, %cst_43 {dimension_numbers = #tpu.dot_dimension_numbers<[0], [0], [1], [1], [0, 1, 1, 1], [], []>} : vector<16x8xbf16>, vector<16x68xbf16>, vector<8x68xf32> -> vector<8x68xf32>
    %154 = vector.extract_strided_slice %153 {offsets = [0, 0], sizes = [8, 64], strides = [1, 1]} : vector<8x68xf32> to vector<8x64xf32>
    %155 = vector.extract_strided_slice %153 {offsets = [0, 64], sizes = [8, 4], strides = [1, 1]} : vector<8x68xf32> to vector<8x4xf32>
    %cst_44 = arith.constant 0.000000e+00 : f32
    %156 = vector.broadcast %cst_44 : f32 to vector<8x4xf32>
    %157 = arith.cmpf ogt, %155, %156 : vector<8x4xf32>
    %cst_45 = arith.constant 1.000000e+00 : f32
    %158 = vector.broadcast %cst_45 : f32 to vector<8x4xf32>
    %159 = arith.divf %158, %155 : vector<8x4xf32>
    %cst_46 = arith.constant 0.000000e+00 : f32
    %160 = vector.broadcast %cst_46 : f32 to vector<8x4xf32>
    %161 = arith.select %157, %159, %160 : vector<8x4xi1>, vector<8x4xf32>
    %162 = arith.truncf %161 : vector<8x4xf32> to vector<8x4xbf16>
    %cst_47 = arith.constant dense<0.000000e+00> : vector<8x64xf32>
    %163 = tpu.matmul %162, %33, %cst_47 {dimension_numbers = #tpu.dot_dimension_numbers<[1], [0], [0], [1], [0, 0, 1, 1], [], []>} : vector<8x4xbf16>, vector<4x64xbf16>, vector<8x64xf32> -> vector<8x64xf32>
    %164 = arith.mulf %154, %163 : vector<8x64xf32>
    %165 = vector.broadcast %120 : vector<1x64xf32> to vector<8x64xf32>
    %166 = arith.mulf %164, %165 : vector<8x64xf32>
    %167 = vector.broadcast %121 : vector<1x64xf32> to vector<8x64xf32>
    %168 = arith.mulf %129, %167 : vector<8x64xf32>
    %169 = arith.addf %166, %168 : vector<8x64xf32>
    %cst_48 = arith.constant dense<0.000000e+00> : vector<8xf32>
    %170 = vector.multi_reduction <add>, %169, %cst_48 [1] : vector<8x64xf32> to vector<8xf32>
    %171 = vector.shape_cast %170 : vector<8xf32> to vector<8x1xf32>
    %172 = arith.negf %171 : vector<8x1xf32>
    %173 = math.exp %172 : vector<8x1xf32>
    %cst_49 = arith.constant 1.000000e+00 : f32
    %174 = vector.broadcast %cst_49 : f32 to vector<8x1xf32>
    %175 = arith.addf %174, %173 : vector<8x1xf32>
    %176 = arith.divf %174, %175 : vector<8x1xf32>
    %177 = vector.broadcast %176 : vector<8x1xf32> to vector<8x64xf32>
    %178 = arith.mulf %177, %129 : vector<8x64xf32>
    %cst_50 = arith.constant 1.000000e+00 : f32
    %179 = vector.broadcast %cst_50 : f32 to vector<8x1xf32>
    %180 = arith.subf %179, %176 : vector<8x1xf32>
    %181 = vector.broadcast %180 : vector<8x1xf32> to vector<8x64xf32>
    %182 = arith.mulf %181, %164 : vector<8x64xf32>
    %183 = arith.addf %178, %182 : vector<8x64xf32>
    %184 = arith.truncf %183 : vector<8x64xf32> to vector<8x64xbf16>
    %cst_51 = arith.constant dense<0.000000e+00> : vector<8x16xf32>
    %185 = tpu.matmul %184, %117, %cst_51 {dimension_numbers = #tpu.dot_dimension_numbers<[1], [0], [0], [1], [0, 0, 1, 1], [], []>} : vector<8x64xbf16>, vector<64x16xbf16>, vector<8x16xf32> -> vector<8x16xf32>
    %186 = vector.broadcast %122 : vector<1x16xf32> to vector<8x16xf32>
    %187 = arith.addf %185, %186 : vector<8x16xf32>
    %cst_52 = arith.constant 0.000000e+00 : f32
    %188 = vector.broadcast %cst_52 : f32 to vector<8x16xf32>
    %189 = arith.maximumf %187, %188 : vector<8x16xf32>
    %190 = vector.extract_strided_slice %34 {offsets = [7, 0], sizes = [2, 8], strides = [1, 1]} : vector<9x256xf32> to vector<2x8xf32>
    %191 = arith.truncf %190 : vector<2x8xf32> to vector<2x8xbf16>
    %192 = vector.extract_strided_slice %34 {offsets = [6, 0], sizes = [1, 256], strides = [1, 1]} : vector<9x256xf32> to vector<1x256xf32>
    %193 = vector.extract_strided_slice %192 {offsets = [0, 0], sizes = [1, 16], strides = [1, 1]} : vector<1x256xf32> to vector<1x16xf32>
    %194 = vector.extract_strided_slice %192 {offsets = [0, 16], sizes = [1, 1], strides = [1, 1]} : vector<1x256xf32> to vector<1x1xf32>
    %195 = arith.truncf %189 : vector<8x16xf32> to vector<8x16xbf16>
    %cst_53 = arith.constant dense<0.000000e+00> : vector<2x16xf32>
    %196 = tpu.matmul %191, %195, %cst_53 {dimension_numbers = #tpu.dot_dimension_numbers<[1], [0], [0], [1], [0, 0, 1, 1], [], []>} : vector<2x8xbf16>, vector<8x16xbf16>, vector<2x16xf32> -> vector<2x16xf32>
    %197 = vector.broadcast %193 : vector<1x16xf32> to vector<2x16xf32>
    %198 = arith.mulf %196, %197 : vector<2x16xf32>
    %cst_54 = arith.constant dense<0.000000e+00> : vector<2xf32>
    %199 = vector.multi_reduction <add>, %198, %cst_54 [1] : vector<2x16xf32> to vector<2xf32>
    %200 = vector.shape_cast %199 : vector<2xf32> to vector<2x1xf32>
    %201 = vector.broadcast %194 : vector<1x1xf32> to vector<2x1xf32>
    %202 = arith.addf %200, %201 : vector<2x1xf32>
    %c0_55 = arith.constant 0 : index
    %c0_56 = arith.constant 0 : index
    %203 = vector.load %arg4[%c0_55, %c0_56] : memref<2x1xf32, #tpu.memory_space<vmem>>, vector<2x1xf32>
    tpu.vector_store %arg4[%c0_55, %c0_56], %202 {strides = array<i32>} : memref<2x1xf32, #tpu.memory_space<vmem>>, vector<2x1xf32>,
    return
  }
}

</mosaic_0001>

<bundles_post_ra>
// kernel: tpu_custom_call.1
= control target key start
LH: loop header
LB: loop body
LE: loop exit
PB: predicated region body
PF: predicated region fallthrough
CT: control target
= control target key end

     0   :  { %9 = vsyncpa [#allocation3], 0  ;;  %s1415_s0 = inlined_call_operand.hbm [shape: f32[8,16], index: 0, kind: input, shape index: {}]   ;;  %s1416_s1 = inlined_call_operand.hbm [shape: bf16[16,20], index: 1, kind: input, shape index: {}]   ;;  %s1417_s2 = inlined_call_operand.hbm [shape: bf16[2,88,256], index: 2, kind: input, shape index: {}]   ;;  %s1418_s3 = inlined_call_operand.hbm [shape: f32[9,256], index: 3, kind: input, shape index: {}]   ;;  %s1419_s4 = inlined_call_operand.vmem [shape: f32[2,1], index: 4, kind: output, shape index: {}]  }
   0x1   :  { %10 = vsyncpa [#allocation5], 0  ;;  %s27_s17 = sshll.u32 %s1416_s1, 4  ;;  %s28_s17 = int_to_ptr.hbm [resolvable:$true] %s27_s17 }
   0x2   :  { %11 = vsyncpa [#allocation8], 0  ;;  %s1151_s18 = smov [#allocation4]   ;;  %s17_s22 = sshll.u32 %s1415_s0, 4  ;;  %s18_s22 = int_to_ptr.hbm [resolvable:$true] %s17_s22 }
   0x3   :  { %s29_s19 = sshll.u32 %s1151_s18, 4  ;;  %s1152_s23 = smov 64   ;;  %s30_s19 = int_to_ptr.vmem [resolvable:$true] %s29_s19 }
   0x4   :  { %s1153_s24 = smov 4   ;;  %s1154_s25 = smov [#allocation2]  }
   0x5   :  { %35 = dma.hbm_to_vmem [thread:$0]  %s28_s17, 128, %s30_s19, [#allocation5], %s1152_s23, %s1152_s23, %s1153_s24  }
   0x6   :  { %s19_s26 = sshll.u32 %s1154_s25, 4  ;;  %s40_s1 = sshll.u32 %s1417_s2, 4  ;;  %s20_s26 = int_to_ptr.vmem [resolvable:$true] %s19_s26  ;;  %s41_s1 = int_to_ptr.hbm [resolvable:$true] %s40_s1 }
   0x7   :  { %22 = dma.hbm_to_vmem [thread:$0]  %s18_s22, 128, %s20_s26, [#allocation3]  }
   0x8   :  { %s1155_s29 = smov [#allocation6]   ;;  %s53_s6 = sshll.u32 %s1418_s3, 4  ;;  %s54_s6 = int_to_ptr.hbm [resolvable:$true] %s53_s6 }
   0x9   :  { %s42_s30 = sshll.u32 %s1155_s29, 4  ;;  %s1156_s7 = smov 128   ;;  %s43_s30 = int_to_ptr.vmem [resolvable:$true] %s42_s30 }
   0xa   :  { %s1157_s8 = smov 8   ;;  %s1158_s9 = smov [#allocation7]  }
   0xb   :  { %48 = dma.hbm_to_vmem [thread:$0]  %s41_s1, 2816, %s43_s30, [#allocation5], %s1156_s7, %s1156_s7, %s1157_s8  }
   0xc   :  { %s55_s10 = sshll.u32 %s1158_s9, 4  ;;  %s1159_s11 = smov 256   ;;  %s56_s10 = int_to_ptr.vmem [resolvable:$true] %s55_s10 }
   0xd   :  { %s1160_s12 = smov 16  }
   0xe   :  { %61 = dma.hbm_to_vmem [thread:$0]  %s54_s6, 512, %s56_s10, [#allocation8], %s1159_s11, %s1159_s11, %s1160_s12  }
   0xf   :  { %1145 = dma.done.wait [#allocation3], 128  }
  0x10   :  { %1146 = vsyncadd [#allocation3], 4294967168 }
  0x11   :  { %1147 = dma.done.wait [#allocation5], 2944  }
  0x12   :  { %1148 = vsyncadd [#allocation5], 4294964352 }
  0x13   :  { %1149 = dma.done.wait [#allocation8], 512  }
  0x14   :  { %1150 = vsyncadd [#allocation8], 4294966784  ;;  %vm208_vm0 = vcmask 1041408   ;;  %v892_v0 = vld [vmem:[#allocation6] sm:$0xf]  ;;  %v142_v5 = vld [vmem:[#allocation2] sm:$0xff]  ;;  %v81_v27 = vlaneseq }
  0x15   :  { %v983_v1 = vld [vmem:[#allocation6 + $0x4] sm:$0xf0]  ;;  %v982_v2 = vld [vmem:[#allocation6 + $0x4] sm:$0xf]  ;;  %v894_v4 = vld [vmem:[#allocation6 + $0x8] sm:$0xf0]  ;;  %v154_v8 = vpack.c.bf16 %v142_v5, %v142_v5 }
  0x16   :  { %v893_v3 = vor.u32 %v983_v1, %v892_v0  ;;  %v1204_v6 = vld [vmem:[#allocation4] sm:$0xff]  ;;  %v897_v7 = vor.u32 %v982_v2, %v894_v4  ;;  %v145_v9 = vld [vmem:[#allocation6 + $0x10] sm:$0xff]  ;;  %vm1424_vm1 = vcmask 130048   ;;  %s1161_s2 = smov 112   ;;  %s1162_s3 = smov 120   ;;  %vm204_vm2 = vcmask 31744  }
  0x17   :  { %202 = vrot.lane.b32.xlu0 %v1204_v6, %s1161_s2  ;;  %v210_v10 = vsel %vm208_vm0, %v145_v9, 0  ;;  %v1216_v12 = vld [vmem:[#allocation7] sm:$0xff]  ;;  %v1220_v14 = vld [vmem:[#allocation7 + $0x8] sm:$0xff]  ;;  %vm1421_vm3 = vcmask 1043456   ;;  %vm1420_vm4 = vcmask 64512   ;;  %v91_v28 = vand.u32 127, %v81_v27 }
  0x18   :  { %178 = vmatpush.bf16.msra.mxu0 %v893_v3  ;;  %191 = vmatpush.bf16.msra.mxu1 %v897_v7  ;;  %v155_v15 = vperm.slane %v1216_v12, 0  ;;  %v156_v16 = vperm.slane %v1220_v14, 0  ;;  %v82_v29 = vshrl.u32 %v81_v27, 7  ;;  %v1163_v39 = vmov 1.0|1.0  }
  0x19   :  { %219 = vmatpush.bf16.msra.mxu2 %v210_v10  ;;  %v101_v30 = vadd.s32 1, %v91_v28  ;;  %v92_v33 = vmul.u32 16, %v91_v28  ;;  %v1164_v0 = vmov 0.0   ;;  %v528_v45 = vperm.slane %v1216_v12, 3 }
  0x1a   :  { %v88_v31 = vadd.s32 48, %v82_v29  ;;  %v89_v32 = vadd.s32 56, %v82_v29  ;;  %v86_v37 = vadd.s32 32, %v82_v29  ;;  %v87_v38 = vadd.s32 40, %v82_v29 }
  0x1b   :  { %898 = vmatmul.msk.bf16.vlgmr.msra.gmra.mxu0 %vm1424_vm1, %v154_v8  ;;  %899 = vmatmul.msk.bf16.vlgmr.msra.gmra.mxu1 %vm1424_vm1, %v154_v8  ;;  %v102_v34 = vmul.u32 16, %v101_v30  ;;  %v84_v42 = vadd.s32 16, %v82_v29  ;;  %v85_v43 = vadd.s32 24, %v82_v29  ;;  %v83_v46 = vadd.s32 8, %v82_v29 }
  0x1c   :  { %vm99_vm5 = vcmp.ge.s32.totalorder %v88_v31, %v92_v33  ;;  %vm100_vm6 = vcmp.ge.s32.totalorder %v89_v32, %v92_v33  ;;  %vm97_vm12 = vcmp.ge.s32.totalorder %v86_v37, %v92_v33  ;;  %vm98_vm13 = vcmp.ge.s32.totalorder %v87_v38, %v92_v33 }
  0x1d   :  { %vm109_vm7 = vcmp.lt.s32.totalorder %v88_v31, %v102_v34  ;;  %vm110_vm8 = vcmp.lt.s32.totalorder %v89_v32, %v102_v34  ;;  %vm107_vm14 = vcmp.lt.s32.totalorder %v86_v37, %v102_v34  ;;  %vm108_vm15 = vcmp.lt.s32.totalorder %v87_v38, %v102_v34 }
  0x1e   :  { %vm1235_vm9 = vmand %vm99_vm5, %vm109_vm7  ;;  %v133_v60 = vadd.s32 1, %v82_v29  ;;  %v131_v61 = vmul.u32 16, %v82_v29  ;;  %v757_v48 = vperm.slane %v1216_v12, 4 }
  0x1f   :  { %250 = vrot.lane.b32.xlu0 %v1204_v6, %s1162_s3  ;;  %vm1239_vm10 = vmand %vm100_vm6, %vm110_vm8  ;;  %vm95_vm8 = vcmp.ge.s32.totalorder %v84_v42, %v92_v33 }
  0x20   :  { %vm1423_vm11 = vmpackc.low %vm1239_vm10, %vm1235_vm9  ;;  %v134_v62 = vmul.u32 16, %v133_v60 }
  0x21   :  { %908 = vmatpush.bf16.msk.msrb.mxu1 %vm1423_vm11, %v1163_v39  ;;  %vm1253_vm5 = vmand %vm97_vm12, %vm107_vm14  ;;  %vm96_vm12 = vcmp.ge.s32.totalorder %v85_v43, %v92_v33  ;;  %vm106_vm14 = vcmp.lt.s32.totalorder %v85_v43, %v102_v34 }
  0x22   :  { %vm1257_vm6 = vmand %vm98_vm13, %vm108_vm15  ;;  %vm105_vm13 = vcmp.lt.s32.totalorder %v84_v42, %v102_v34  ;;  %v431_v42 = vperm.slane %v1216_v12, 1 }
  0x23   :  { %vm1422_vm7 = vmpackc.low %vm1257_vm6, %vm1253_vm5 }
  0x24   :  { %vm1271_vm15 = vmand %vm95_vm8, %vm105_vm13  ;;  %vm93_vm8 = vcmp.ge.s32.totalorder %v82_v29, %v92_v33  ;;  %vm94_vm13 = vcmp.ge.s32.totalorder %v83_v46, %v92_v33 }
  0x25   :  { %910 = vmatpush.bf16.msk.msrb.mxu1 %vm1422_vm7, %v1163_v39  ;;  %vm103_vm7 = vcmp.lt.s32.totalorder %v82_v29, %v102_v34 }
  0x89   :  { %v1212_v11 = vpop.permute.xlu0 %202 }
  0x8a   :  { %904 = vmatmul.msk.bf16.vlgmr.msra.gmra.mxu2 %vm204_vm2, %v1212_v11 }
  0x91   :  { %v1218_v13 = vpop.permute.xlu0 %250 }
  0x92   :  { %361 = vxpose.xlu0.c.b16.start.end [1/1] (short) (narrow) %v1218_v13, 16 }
  0x98   :  { %v180_v17 = vpop.f32.mrf.mxu0  ;;  %v193_v19 = vpop.f32.mrf.mxu1 }
  0x99   :  { %v181_v18 = vadd.f32 %v180_v17, %v155_v15  ;;  %v1225_v20 = vadd.f32 %v193_v19, %v156_v16 }
  0x9b   :  { %v226_v21 = vpack.c.bf16 %v181_v18, %v181_v18  ;;  %v249_v22 = vpack.c.bf16 %v1225_v20, %v1225_v20  ;;  %v433_v43 = vmul.f32 %v431_v42, %v1225_v20 }
  0x9d   :  { %v233_v23 = vsel %vm1421_vm3, %v226_v21, 0  ;;  %v256_v24 = vsel %vm1421_vm3, %v249_v22, 0 }
  0x9e   :  { %242 = vmatpush.bf16.msra.mxu3 %v233_v23  ;;  %265 = vmatpush.bf16.msrb.mxu0 %v256_v24 }
  0xa0   :  { %v182_v25 = vpop.f32.mrf.mxu0  ;;  %v195_v26 = vpop.f32.mrf.mxu1 }
  0xa1   :  { %905 = vmatmul.msk.bf16.vlgmr.msra.gmra.mxu3 %vm1420_vm4, %v1204_v6  ;;  %906 = vmatmul.msk.bf16.vlgmr.msrb.gmra.mxu0 %vm1420_vm4, %v1218_v13  ;;  %vm1275_vm4 = vmand %vm96_vm12, %vm106_vm14  ;;  %vm104_vm12 = vcmp.lt.s32.totalorder %v83_v46, %v102_v34 }
  0xa2   :  { %vm1426_vm3 = vmpackc.low %vm1275_vm4, %vm1271_vm15 }
  0xa3   :  { %912 = vmatpush.bf16.msk.msrb.mxu1 %vm1426_vm3, %v1163_v39  ;;  %vm1289_vm14 = vmand %vm93_vm8, %vm103_vm7  ;;  %vm1427_vm7 = vcmask 523264   ;;  %vm132_vm8 = vcmp.ge.s32.totalorder %v91_v28, %v131_v61 }
  0xa4   :  { %vm1293_vm11 = vmand %vm94_vm13, %vm104_vm12  ;;  %vm135_vm13 = vcmp.lt.s32.totalorder %v91_v28, %v134_v62 }
  0xa5   :  { %vm1425_vm1 = vmpackc.low %vm1293_vm11, %vm1289_vm14 }
  0xa6   :  { %vm136_vm12 = vmand %vm132_vm8, %vm135_vm13  ;;  %vm1444_vm8 = vcmask 130048  }
  0xa7   :  { %914 = vmatpush.bf16.msk.msrb.mxu1 %vm1425_vm1, %v1163_v39  ;;  %v137_v1 = vsel %vm136_vm12, 1.0, %v1164_v0 }
  0xa8   :  { %v138_v2 = vpack.c.bf16 %v137_v1, %v137_v1 }
  0xaa   :  { %v1309_v3 = vsel %vm208_vm0, %v138_v2, 0 }
  0xab   :  { %324 = vmatpush.bf16.msrb.mxu2 %v1309_v3  ;;  %424 = vmatpush.bf16.msra.mxu0 %v1309_v3 }
 0x10d   :  { %v221_v49 = vpop.f32.mrf.mxu2 }
 0x115   :  { %v223_v53 = vpop.f32.mrf.mxu2 }
 0x11e   :  { %v267_v50 = vpop.f32.mrf.mxu0 }
 0x124   :  { %v244_v51 = vpop.f32.mrf.mxu3 }
 0x125   :  { %v245_v52 = vadd.f32 %v244_v51, %v221_v49 }
 0x126   :  { %v269_v56 = vpop.f32.mrf.mxu0 }
 0x127   :  { %v272_v57 = vmul.f32 %v267_v50, %v245_v52 }
 0x12c   :  { %v246_v54 = vpop.f32.mrf.mxu3 }
 0x12d   :  { %v247_v55 = vadd.f32 %v246_v54, %v223_v53 }
 0x12f   :  { %v273_v58 = vmul.f32 %v269_v56, %v247_v55 }
 0x131   :  { %v274_v59 = vpack.c.bf16 %v273_v58, %v272_v57 }
 0x133   :  { %915 = vmatmul.msk.bf16.vlgmr.msrb.gmra.mxu1 %vm1427_vm7, %v274_v59 }
 0x13e   :  { %v1325_v57 = vpop.trf.xlu0 }
 0x1b0   :  { %v288_v63 = vpop.f32.mrf.mxu1 }
 0x1b1   :  { %v293_v4 = vmul.f32 0.25, %v288_v63 }
 0x1b3   :  { %v295_v8 = vsel %vm204_vm2, %v293_v4, -inf }
 0x1b8   :  { %v290_v5 = vpop.f32.mrf.mxu1 }
 0x1b9   :  { %v294_v7 = vmul.f32 0.25, %v290_v5 }
 0x1bb   :  { %v296_v9 = vsel %vm204_vm2, %v294_v7, -inf }
 0x1bc   :  { %v297_v10 = vmax.f32 %v295_v8, %v296_v9 }
 0x1be   :  { %v298_v15 = vrot.slane %v297_v10, 4 }
 0x1c0   :  { %v299_v16 = vmax.f32 %v297_v10, %v298_v15  ;;  %v518_v10 = vld [vmem:[#allocation6 + $0x68] sm:$0xff] }
 0x1c1   :  { %v570_v15 = vsel %vm208_vm0, %v518_v10, 0 }
 0x1c2   :  { %v300_v17 = vrot.slane %v299_v16, 2  ;;  %579 = vmatpush.bf16.msrb.mxu0 %v570_v15  ;;  %v529_v15 = vperm.slane %v1220_v14, 3 }
 0x1c4   :  { %v301_v18 = vmax.f32 %v299_v16, %v300_v17 }
 0x1c6   :  { %v302_v19 = vrot.slane %v301_v18, 1 }
 0x1c8   :  { %v303_v21 = vmax.f32 %v301_v18, %v302_v19 }
 0x1ca   :  { %v304_v22 = vsub.f32 %v293_v4, %v303_v21  ;;  %v305_v23 = vsub.f32 %v294_v7, %v303_v21 }
 0x1cc   :  { %v306_v24 = vmul.f32 1.442695, %v304_v22  ;;  %v308_v25 = vmul.f32 1.442695, %v305_v23 }
 0x1ce   :  { %1029 = vpow2.f32 %v306_v24 }
 0x1cf   :  { %1031 = vpow2.f32 %v308_v25 }
 0x1d4   :  { %v1030_v26 = vpop.eup %1029 }
 0x1d5   :  { %v1032_v27 = vpop.eup %1031 }
 0x1d6   :  { %v310_v28 = vpack.c.bf16 %v1032_v27, %v1030_v26  ;;  %v1014_v29 = vpack.i.bf16 %v1032_v27, %v1030_v26 }
 0x1d8   :  { %916 = vmatmul.msk.bf16.vlgmr.msrb.gmra.mxu2 %vm204_vm2, %v310_v28 }
 0x25b   :  { %v326_v30 = vpop.f32.mrf.mxu2 }
 0x25c   :  { %333 = vrot.lane.b32.xlu1 %v326_v30, %s1152_s23 }
 0x263   :  { %v328_v31 = vpop.f32.mrf.mxu2 }
 0x264   :  { %335 = vrot.lane.b32.xlu1 %v328_v31, %s1152_s23 }
 0x2ce   :  { %v334_v32 = vpop.permute.xlu1 %333 }
 0x2cf   :  { %v339_v34 = vmul.f32 %v334_v32, %v245_v52 }
 0x2d6   :  { %v336_v33 = vpop.permute.xlu1 %335 }
 0x2d7   :  { %v340_v37 = vmul.f32 %v336_v33, %v247_v55 }
 0x2d9   :  { %v1009_v38 = vpack.i.bf16 %v340_v37, %v339_v34 }
 0x2db   :  { %1010 = vrot.lane.b32.xlu2 %v1009_v38, %s1152_s23 }
 0x2e3   :  { %1015 = vrot.lane.b32.xlu2 %v1014_v29, %s1152_s23 }
 0x2eb   :  { %435 = vrot.lane.b32.xlu2 %v433_v43, %s1152_s23 }
 0x335   :  { %v1011_v46 = vpop.permute.xlu2 %1010 }
 0x336   :  { %v1013_v50 = vunpack.i.h.bf16 %v1011_v46  ;;  %v1012_v51 = vunpack.i.l.bf16 %v1011_v46 }
 0x33d   :  { %v1016_v49 = vpop.permute.xlu2 %1015 }
 0x33e   :  { %v1018_v53 = vunpack.i.h.bf16 %v1016_v49  ;;  %v1017_v54 = vunpack.i.l.bf16 %v1016_v49  ;;  %v934_v49 = vld [vmem:[#allocation6 + $0x48] sm:$0xf] }
 0x340   :  { %v357_v52 = vsel %vm1427_vm7, %v1012_v51, %v1017_v54  ;;  %v358_v55 = vsel %vm1427_vm7, %v1013_v50, %v1018_v53  ;;  %v987_v50 = vld [vmem:[#allocation6 + $0x4c] sm:$0xf0]  ;;  %v930_v51 = vld [vmem:[#allocation6 + $0x38] sm:$0xf]  ;;  %v986_v54 = vld [vmem:[#allocation6 + $0x3c] sm:$0xf0] }
 0x341   :  { %v359_v56 = vpack.c.bf16 %v358_v55, %v357_v52  ;;  %v935_v53 = vor.u32 %v987_v50, %v934_v49  ;;  %v931_v52 = vor.u32 %v986_v54, %v930_v51  ;;  %v926_v55 = vld [vmem:[#allocation6 + $0x28] sm:$0xf] }
 0x343   :  { %387 = vmatpush.bf16.msrb.mxu3 %v359_v56  ;;  %505 = vmatpush.bf16.msra.mxu1 %v935_v53  ;;  %v985_v56 = vld [vmem:[#allocation6 + $0x2c] sm:$0xf0] }
 0x345   :  { %v436_v21 = vpop.permute.xlu2 %435 }
 0x346   :  { %917 = vmatmul.msk.bf16.vlgmr.msrb.gmra.mxu3 %vm1444_vm8, %v1325_v57 }
 0x347   :  { %506 = vmatpush.bf16.msra.mxu1 %v931_v52 }
 0x3c9   :  { %v389_v58 = vpop.f32.mrf.mxu3 }
 0x3ca   :  { %1033 = vrcp.f32 %v389_v58  ;;  %v405_v63 = vand.u32 2147483648, %v389_v58  ;;  %v403_v1 = vand.u32 2147483647, %v389_v58  ;;  %vm399_vm12 = vweird.f32 %v389_v58 }
 0x3cb   :  { %vm393_vm7 = vcmp.gt.f32.partialorder %v389_v58, 0.0 }
 0x3cc   :  { %v406_v4 = vor.u32 1.1754944e-38, %v405_v63  ;;  %vm404_vm3 = vcmp.eq.f32.partialorder %v403_v1, 8.507059e+37 }
 0x3d0   :  { %v1034_v59 = vpop.eup %1033 }
 0x3d1   :  { %v391_v60 = vpop.f32.mrf.mxu3  ;;  %v395_v61 = vmul.f32 %v1034_v59, %v389_v58  ;;  %vm400_vm13 = vweird.f32 %v1034_v59 }
 0x3d2   :  { %vm401_vm1 = vmor %vm399_vm12, %vm400_vm13  ;;  %v984_v60 = vld [vmem:[#allocation6 + $0x1c] sm:$0xf0] }
 0x3d3   :  { %v396_v62 = vsub.f32 1.0, %v395_v61  ;;  %vm1447_vm12 = vmpackc.low %vm1239_vm10, %vm1235_vm9  ;;  %vm1451_vm10 = vcmask 130048  }
 0x3d4   :  { %vm1450_vm9 = vmpackc.low %vm1293_vm11, %vm1289_vm14 }
 0x3d5   :  { %v397_v0 = vmul.f32 %v1034_v59, %v396_v62 }
 0x3d7   :  { %v398_v2 = vadd.f32 %v1034_v59, %v397_v0 }
 0x3d9   :  { %v402_v5 = vsel %vm401_vm1, %v1034_v59, %v398_v2  ;;  %vm1445_vm1 = vcmask 523264   ;;  %v922_v59 = vld [vmem:[#allocation6 + $0x18] sm:$0xf] }
 0x3da   :  { %v407_v7 = vsel %vm404_vm3, %v406_v4, %v402_v5  ;;  %v923_v61 = vor.u32 %v984_v60, %v922_v59  ;;  %vm1446_vm13 = vmmov %vm1445_vm1  ;;  %v939_v4 = vld [vmem:[#allocation6 + $0x58] sm:$0xf]  ;;  %v989_v5 = vld [vmem:[#allocation6 + $0x5c] sm:$0xf0] }
 0x3db   :  { %v409_v8 = vsel %vm393_vm7, %v407_v7, 0.0  ;;  %v988_v7 = vld [vmem:[#allocation6 + $0x5c] sm:$0xf]  ;;  %vm1457_vm14 = vmmov %vm1446_vm13 }
 0x3dc   :  { %v410_v9 = vpack.c.bf16 %v409_v8, %v409_v8  ;;  %v940_v8 = vor.u32 %v989_v5, %v939_v4 }
 0x3de   :  { %412 = vrot.lane.b32.xlu1 %v410_v9, %s1152_s23  ;;  %v941_v9 = vld [vmem:[#allocation6 + $0x60] sm:$0xf0]  ;;  %550 = vmatpush.bf16.msra.mxu2 %v940_v8 }
 0x3df   :  { %v944_v10 = vor.u32 %v988_v7, %v941_v9 }
 0x3e1   :  { %563 = vmatpush.bf16.msra.mxu3 %v944_v10 }
 0x3e5   :  { %951 = vmatpush.bf16.msk.msrb.mxu3 %vm1447_vm12, %v1163_v39 }
 0x450   :  { %v413_v16 = vpop.permute.xlu1 %412 }
 0x451   :  { %918 = vmatmul.msk.bf16.vlgmr.msra.gmra.mxu0 %vm204_vm2, %v413_v16 }
 0x452   :  { %670 = vmatpush.bf16.msra.mxu0 %v1309_v3 }
 0x461   :  { %947 = vmatmul.msk.bf16.vlgmr.msrb.gmra.mxu0 %vm204_vm2, %v1212_v11 }
 0x4ce   :  { %v426_v17 = vpop.f32.mrf.mxu0 }
 0x4cf   :  { %v430_v18 = vmul.f32 %v426_v17, %v389_v58  ;;  %v927_v58 = vor.u32 %v985_v56, %v926_v55 }
 0x4d1   :  { %v432_v19 = vmul.f32 %v431_v42, %v430_v18  ;;  %507 = vmatpush.bf16.msra.mxu1 %v927_v58 }
 0x4d3   :  { %v438_v22 = vadd.f32 %v436_v21, %v432_v19 }
 0x4d5   :  { %v439_v23 = vsel %vm1445_vm1, %v438_v22, 0.0  ;;  %508 = vmatpush.bf16.msra.mxu1 %v923_v61  ;;  %vm1448_vm1 = vmpackc.low %vm1257_vm6, %vm1253_vm5  ;;  %vm1455_vm6 = vcmask 64512  }
 0x4d6   :  { %440 = vadd.xlane.f32.xlu1 %v439_v23  ;;  %v428_v24 = vpop.f32.mrf.mxu0  ;;  %953 = vmatpush.bf16.msk.msrb.mxu3 %vm1448_vm1, %v1163_v39  ;;  %vm1452_vm5 = vmmov %vm1451_vm10 }
 0x549   :  { %v441_v25 = vpop.xlane.xlu1 %440 }
 0x54a   :  { %v919_v26 = vmul.f32 -1.442695, %v441_v25 }
 0x54c   :  { %1035 = vpow2.f32 %v919_v26  ;;  %v581_v26 = vpop.f32.mrf.mxu0 }
 0x552   :  { %v1036_v27 = vpop.eup %1035 }
 0x553   :  { %v445_v28 = vadd.f32 1.0, %v1036_v27 }
 0x555   :  { %1037 = vrcp.f32 %v445_v28  ;;  %v457_v32 = vand.u32 2147483648, %v445_v28  ;;  %v455_v33 = vand.u32 2147483647, %v445_v28  ;;  %vm451_vm3 = vweird.f32 %v445_v28 }
 0x557   :  { %v458_v37 = vor.u32 1.1754944e-38, %v457_v32  ;;  %vm456_vm8 = vcmp.eq.f32.partialorder %v455_v33, 8.507059e+37 }
 0x55b   :  { %v1038_v29 = vpop.eup %1037 }
 0x55c   :  { %v447_v30 = vmul.f32 %v1038_v29, %v445_v28  ;;  %vm452_vm0 = vweird.f32 %v1038_v29 }
 0x55d   :  { %vm453_vm7 = vmor %vm451_vm3, %vm452_vm0 }
 0x55e   :  { %v448_v31 = vsub.f32 1.0, %v447_v30  ;;  %vm1449_vm0 = vmpackc.low %vm1275_vm4, %vm1271_vm15  ;;  %vm1453_vm4 = vcmask 1043456  }
 0x55f   :  { %955 = vmatpush.bf16.msk.msrb.mxu3 %vm1449_vm0, %v1163_v39  ;;  %vm1454_vm11 = vmmov %vm1453_vm4 }
 0x560   :  { %v449_v11 = vmul.f32 %v1038_v29, %v448_v31  ;;  %vm1456_vm15 = vmmov %vm1455_vm6 }
 0x561   :  { %vm1458_vm3 = vmmov %vm1446_vm13 }
 0x562   :  { %v450_v34 = vadd.f32 %v1038_v29, %v449_v11 }
 0x563   :  { %957 = vmatpush.bf16.msk.msrb.mxu3 %vm1450_vm9, %v1163_v39 }
 0x564   :  { %v454_v38 = vsel %vm453_vm7, %v1038_v29, %v450_v34  ;;  %v583_v29 = vpop.f32.mrf.mxu0  ;;  %vm1459_vm7 = vmmov %vm1458_vm3 }
 0x565   :  { %v459_v42 = vsel %vm456_vm8, %v458_v37, %v454_v38  ;;  %vm1460_vm8 = vmmov %vm1452_vm5 }
 0x566   :  { %v462_v43 = vsub.f32 1.0, %v459_v42  ;;  %v461_v62 = vmul.f32 %v459_v42, %v1225_v20  ;;  %v470_v20 = vperm.slane %v1216_v12, 2 }
 0x568   :  { %v463_v46 = vmul.f32 %v462_v43, %v430_v18 }
 0x56a   :  { %465 = vrot.lane.b32.xlu2 %v463_v46, %s1152_s23 }
 0x5c4   :  { %v466_v63 = vpop.permute.xlu2 %465 }
 0x5c5   :  { %v468_v0 = vadd.f32 %v466_v63, %v461_v62 }
 0x5c7   :  { %v469_v1 = vpack.c.bf16 %v468_v0, %v468_v0 }
 0x5c9   :  { %472 = vrot.lane.b32.xlu2 %v469_v1, %s1152_s23 }
 0x623   :  { %v473_v2 = vpop.permute.xlu2 %472 }
 0x624   :  { %936 = vmatmul.msk.bf16.vlgmr.msra.gmra.mxu1 %vm1446_vm13, %v473_v2 }
 0x6a1   :  { %v510_v35 = vpop.f32.mrf.mxu1 }
 0x6a2   :  { %v511_v36 = vadd.f32 %v510_v35, %v470_v20 }
 0x6a4   :  { %v514_v40 = vmax.f32 %v511_v36, 0.0 }
 0x6a6   :  { %v527_v41 = vpack.c.bf16 %v514_v40, %v514_v40 }
 0x6a8   :  { %945 = vmatmul.msk.bf16.vlgmr.msra.gmra.mxu2 %vm1451_vm10, %v527_v41  ;;  %946 = vmatmul.msk.bf16.vlgmr.msra.gmra.mxu3 %vm1452_vm5, %v527_v41  ;;  %vm1461_vm10 = vmmov %vm1458_vm3 }
 0x6a9   :  { %v512_v44 = vpop.f32.mrf.mxu1 }
 0x72b   :  { %v552_v47 = vpop.f32.mrf.mxu2  ;;  %v565_v16 = vpop.f32.mrf.mxu3 }
 0x72c   :  { %v553_v39 = vadd.f32 %v552_v47, %v528_v45  ;;  %v1370_v17 = vadd.f32 %v565_v16, %v529_v15 }
 0x72e   :  { %v586_v18 = vpack.c.bf16 %v553_v39, %v553_v39  ;;  %v604_v19 = vpack.c.bf16 %v1370_v17, %v1370_v17  ;;  %v759_v21 = vmul.f32 %v757_v48, %v1370_v17 }
 0x730   :  { %v588_v22 = vsel %vm1453_vm4, %v586_v18, 0  ;;  %761 = vrot.lane.b32.xlu1 %v759_v21, %s1152_s23  ;;  %v606_v14 = vsel %vm1454_vm11, %v604_v19, 0 }
 0x731   :  { %597 = vmatpush.bf16.msrb.mxu1 %v588_v22  ;;  %615 = vmatpush.bf16.msrb.mxu2 %v606_v14 }
 0x733   :  { %v554_v23 = vpop.f32.mrf.mxu2  ;;  %v567_v24 = vpop.f32.mrf.mxu3 }
 0x734   :  { %948 = vmatmul.msk.bf16.vlgmr.msrb.gmra.mxu1 %vm1455_vm6, %v1204_v6  ;;  %949 = vmatmul.msk.bf16.vlgmr.msrb.gmra.mxu2 %vm1456_vm15, %v1218_v13  ;;  %vm1462_vm6 = vmmov %vm1458_vm3  ;;  %vm1463_vm15 = vcmask 1043456  }
 0x735   :  { %750 = vmatpush.bf16.msra.mxu2 %v1309_v3 }
 0x7b1   :  { %v599_v25 = vpop.f32.mrf.mxu1 }
 0x7b2   :  { %v600_v30 = vadd.f32 %v599_v25, %v581_v26 }
 0x7b7   :  { %v617_v27 = vpop.f32.mrf.mxu2 }
 0x7b8   :  { %v622_v11 = vmul.f32 %v617_v27, %v600_v30 }
 0x7b9   :  { %v601_v28 = vpop.f32.mrf.mxu1 }
 0x7ba   :  { %v602_v31 = vadd.f32 %v601_v28, %v583_v29 }
 0x7bf   :  { %v619_v32 = vpop.f32.mrf.mxu2 }
 0x7c0   :  { %v623_v33 = vmul.f32 %v619_v32, %v602_v31 }
 0x7c2   :  { %v624_v34 = vpack.c.bf16 %v623_v33, %v622_v11 }
 0x7c4   :  { %958 = vmatmul.msk.bf16.vlgmr.msrb.gmra.mxu3 %vm1457_vm14, %v624_v34  ;;  %vm1464_vm14 = vcmask 64512  }
 0x847   :  { %v637_v3 = vpop.f32.mrf.mxu3 }
 0x848   :  { %v642_v37 = vmul.f32 0.25, %v637_v3 }
 0x84a   :  { %v644_v42 = vsel %vm204_vm2, %v642_v37, -inf }
 0x84f   :  { %v639_v38 = vpop.f32.mrf.mxu3 }
 0x850   :  { %v643_v6 = vmul.f32 0.25, %v639_v38 }
 0x852   :  { %v645_v13 = vsel %vm204_vm2, %v643_v6, -inf }
 0x853   :  { %v646_v43 = vmax.f32 %v644_v42, %v645_v13 }
 0x855   :  { %v647_v46 = vrot.slane %v646_v43, 4 }
 0x857   :  { %v648_v49 = vmax.f32 %v646_v43, %v647_v46 }
 0x859   :  { %v649_v50 = vrot.slane %v648_v49, 2 }
 0x85b   :  { %v650_v51 = vmax.f32 %v648_v49, %v649_v50 }
 0x85d   :  { %v651_v53 = vrot.slane %v650_v51, 1 }
 0x85f   :  { %v652_v54 = vmax.f32 %v650_v51, %v651_v53 }
 0x861   :  { %v653_v52 = vsub.f32 %v642_v37, %v652_v54  ;;  %v654_v55 = vsub.f32 %v643_v6, %v652_v54 }
 0x863   :  { %v655_v56 = vmul.f32 1.442695, %v653_v52  ;;  %v657_v58 = vmul.f32 1.442695, %v654_v55  ;;  %v977_v52 = vld [vmem:[#allocation6 + $0xa0] sm:$0xf] }
 0x864   :  { %v993_v55 = vld [vmem:[#allocation6 + $0xa4] sm:$0xf0] }
 0x865   :  { %1039 = vpow2.f32 %v655_v56  ;;  %v973_v56 = vld [vmem:[#allocation6 + $0x90] sm:$0xf] }
 0x866   :  { %1041 = vpow2.f32 %v657_v58  ;;  %v978_v58 = vor.u32 %v993_v55, %v977_v52 }
 0x868   :  { %831 = vmatpush.bf16.msra.mxu3 %v978_v58 }
 0x86b   :  { %v1040_v59 = vpop.eup %1039 }
 0x86c   :  { %v1042_v60 = vpop.eup %1041 }
 0x86d   :  { %v659_v61 = vpack.c.bf16 %v1042_v60, %v1040_v59  ;;  %v1024_v62 = vpack.i.bf16 %v1042_v60, %v1040_v59  ;;  %v992_v59 = vld [vmem:[#allocation6 + $0x94] sm:$0xf0] }
 0x86e   :  { %v974_v60 = vor.u32 %v992_v59, %v973_v56 }
 0x86f   :  { %959 = vmatmul.msk.bf16.vlgmr.msra.gmra.mxu0 %vm204_vm2, %v659_v61  ;;  %v969_v61 = vld [vmem:[#allocation6 + $0x80] sm:$0xf] }
 0x870   :  { %832 = vmatpush.bf16.msra.mxu3 %v974_v60 }
 0x8ec   :  { %v672_v63 = vpop.f32.mrf.mxu0 }
 0x8ed   :  { %679 = vrot.lane.b32.xlu2 %v672_v63, %s1152_s23 }
 0x8f4   :  { %v674_v0 = vpop.f32.mrf.mxu0 }
 0x8f5   :  { %681 = vrot.lane.b32.xlu2 %v674_v0, %s1152_s23  ;;  %v965_v0 = vld [vmem:[#allocation6 + $0x70] sm:$0xf] }
 0x8fd   :  { %1025 = vrot.lane.b32.xlu2 %v1024_v62, %s1152_s23  ;;  %v991_v62 = vld [vmem:[#allocation6 + $0x84] sm:$0xf0] }
 0x8fe   :  { %v970_v63 = vor.u32 %v991_v62, %v969_v61 }
 0x900   :  { %833 = vmatpush.bf16.msra.mxu3 %v970_v63 }
 0x947   :  { %v680_v1 = vpop.permute.xlu2 %679 }
 0x948   :  { %v685_v4 = vmul.f32 %v680_v1, %v600_v30  ;;  %v762_v30 = vpop.permute.xlu1 %761  ;;  %v990_v1 = vld [vmem:[#allocation6 + $0x74] sm:$0xf0] }
 0x94f   :  { %v682_v2 = vpop.permute.xlu2 %681 }
 0x950   :  { %v686_v5 = vmul.f32 %v682_v2, %v602_v31  ;;  %v966_v2 = vor.u32 %v990_v1, %v965_v0 }
 0x952   :  { %v1019_v7 = vpack.i.bf16 %v686_v5, %v685_v4  ;;  %834 = vmatpush.bf16.msra.mxu3 %v966_v2 }
 0x954   :  { %1020 = vrot.lane.b32.xlu0 %v1019_v7, %s1152_s23 }
 0x957   :  { %v1026_v8 = vpop.permute.xlu2 %1025 }
 0x958   :  { %v1028_v10 = vunpack.i.h.bf16 %v1026_v8  ;;  %v1027_v20 = vunpack.i.l.bf16 %v1026_v8 }
 0x9c6   :  { %v1021_v9 = vpop.permute.xlu0 %1020 }
 0x9c7   :  { %v1023_v35 = vunpack.i.h.bf16 %v1021_v9  ;;  %v1022_v36 = vunpack.i.l.bf16 %v1021_v9 }
 0x9c9   :  { %v703_v40 = vsel %vm1458_vm3, %v1022_v36, %v1027_v20  ;;  %v704_v41 = vsel %vm1459_vm7, %v1023_v35, %v1028_v10  ;;  %v141_v10 = vld [vmem:[#allocation7 + $0x10] sm:$0x1]  ;;  %v796_v35 = vperm.slane %v1216_v12, 5  ;;  %vm872_vm3 = vcmask 123904  }
 0x9ca   :  { %v705_v44 = vpack.c.bf16 %v704_v41, %v703_v40  ;;  %v841_v20 = vpack.c.bf16 %v141_v10, %v1216_v12  ;;  %vm881_vm7 = vcmask 1024  }
 0x9cc   :  { %713 = vmatpush.bf16.msra.mxu1 %v705_v44  ;;  %v844_v36 = vshrl.u32 %v841_v20, 16  ;;  %v847_v40 = vshll.u32 %v841_v20, 16 }
 0x9cf   :  { %960 = vmatmul.msk.bf16.vlgmr.msra.gmra.mxu1 %vm1460_vm8, %v1325_v57 }
 0xa4c   :  { %v715_v45 = vpop.f32.mrf.mxu1 }
 0xa4d   :  { %1043 = vrcp.f32 %v715_v45  ;;  %v731_v18 = vand.u32 2147483648, %v715_v45  ;;  %v729_v21 = vand.u32 2147483647, %v715_v45  ;;  %vm725_vm12 = vweird.f32 %v715_v45 }
 0xa4e   :  { %vm719_vm9 = vcmp.gt.f32.partialorder %v715_v45, 0.0 }
 0xa4f   :  { %v732_v14 = vor.u32 1.1754944e-38, %v731_v18  ;;  %vm730_vm0 = vcmp.eq.f32.partialorder %v729_v21, 8.507059e+37 }
 0xa53   :  { %v1044_v15 = vpop.eup %1043 }
 0xa54   :  { %v717_v47 = vpop.f32.mrf.mxu1  ;;  %v721_v16 = vmul.f32 %v1044_v15, %v715_v45  ;;  %vm726_vm13 = vweird.f32 %v1044_v15 }
 0xa55   :  { %vm727_vm1 = vmor %vm725_vm12, %vm726_vm13 }
 0xa56   :  { %v722_v39 = vsub.f32 1.0, %v721_v16 }
 0xa58   :  { %v723_v19 = vmul.f32 %v1044_v15, %v722_v39 }
 0xa5a   :  { %v724_v22 = vadd.f32 %v1044_v15, %v723_v19  ;;  %v870_v19 = vperm.slane %v1216_v12, 6 }
 0xa5c   :  { %v728_v23 = vsel %vm727_vm1, %v1044_v15, %v724_v22  ;;  %v846_v15 = vrot.slane %v844_v36, 3 }
 0xa5d   :  { %v733_v24 = vsel %vm730_vm0, %v732_v14, %v728_v23 }
 0xa5e   :  { %v735_v25 = vsel %vm719_vm9, %v733_v24, 0.0 }
 0xa5f   :  { %v736_v57 = vpack.c.bf16 %v735_v25, %v735_v25 }
 0xa61   :  { %738 = vrot.lane.b32.xlu2 %v736_v57, %s1152_s23 }
 0xabb   :  { %v739_v26 = vpop.permute.xlu2 %738 }
 0xabc   :  { %961 = vmatmul.msk.bf16.vlgmr.msra.gmra.mxu2 %vm204_vm2, %v739_v26 }
 0xb3f   :  { %v752_v27 = vpop.f32.mrf.mxu2 }
 0xb40   :  { %v756_v28 = vmul.f32 %v752_v27, %v715_v45 }
 0xb42   :  { %v758_v29 = vmul.f32 %v757_v48, %v756_v28 }
 0xb44   :  { %v764_v31 = vadd.f32 %v762_v30, %v758_v29 }
 0xb46   :  { %v765_v32 = vsel %vm1461_vm10, %v764_v31, 0.0 }
 0xb47   :  { %766 = vadd.xlane.f32.xlu2 %v765_v32  ;;  %v754_v11 = vpop.f32.mrf.mxu2 }
 0xbba   :  { %v767_v33 = vpop.xlane.xlu2 %766 }
 0xbbb   :  { %v962_v34 = vmul.f32 -1.442695, %v767_v33 }
 0xbbd   :  { %1045 = vpow2.f32 %v962_v34 }
 0xbc3   :  { %v1046_v3 = vpop.eup %1045 }
 0xbc4   :  { %v771_v37 = vadd.f32 1.0, %v1046_v3 }
 0xbc6   :  { %1047 = vrcp.f32 %v771_v37  ;;  %v783_v13 = vand.u32 2147483648, %v771_v37  ;;  %v781_v46 = vand.u32 2147483647, %v771_v37  ;;  %vm777_vm5 = vweird.f32 %v771_v37 }
 0xbc8   :  { %v784_v49 = vor.u32 1.1754944e-38, %v783_v13  ;;  %vm782_vm11 = vcmp.eq.f32.partialorder %v781_v46, 8.507059e+37 }
 0xbcc   :  { %v1048_v38 = vpop.eup %1047 }
 0xbcd   :  { %v773_v6 = vmul.f32 %v1048_v38, %v771_v37  ;;  %vm778_vm2 = vweird.f32 %v1048_v38 }
 0xbce   :  { %vm779_vm4 = vmor %vm777_vm5, %vm778_vm2 }
 0xbcf   :  { %v774_v42 = vsub.f32 1.0, %v773_v6 }
 0xbd1   :  { %v775_v43 = vmul.f32 %v1048_v38, %v774_v42 }
 0xbd3   :  { %v776_v48 = vadd.f32 %v1048_v38, %v775_v43 }
 0xbd5   :  { %v780_v50 = vsel %vm779_vm4, %v1048_v38, %v776_v48 }
 0xbd6   :  { %v785_v51 = vsel %vm782_vm11, %v784_v49, %v780_v50 }
 0xbd7   :  { %v788_v53 = vsub.f32 1.0, %v785_v51  ;;  %v787_v4 = vmul.f32 %v785_v51, %v1370_v17  ;;  %v849_v17 = vrot.slane %v847_v40, 4 }
 0xbd9   :  { %v789_v54 = vmul.f32 %v788_v53, %v756_v28  ;;  %v850_v39 = vor.u32 %v849_v17, %v846_v15 }
 0xbdb   :  { %791 = vrot.lane.b32.xlu1 %v789_v54, %s1152_s23 }
 0xc4d   :  { %v792_v5 = vpop.permute.xlu1 %791 }
 0xc4e   :  { %v794_v7 = vadd.f32 %v792_v5, %v787_v4 }
 0xc50   :  { %v795_v8 = vpack.c.bf16 %v794_v7, %v794_v7 }
 0xc52   :  { %798 = vrot.lane.b32.xlu1 %v795_v8, %s1152_s23 }
 0xcc4   :  { %v799_v9 = vpop.permute.xlu1 %798 }
 0xcc5   :  { %979 = vmatmul.msk.bf16.vlgmr.msra.gmra.mxu3 %vm1462_vm6, %v799_v9 }
 0xd48   :  { %v836_v41 = vpop.f32.mrf.mxu3 }
 0xd49   :  { %v837_v44 = vadd.f32 %v836_v41, %v796_v35 }
 0xd4b   :  { %v840_v45 = vmax.f32 %v837_v44, 0.0 }
 0xd4d   :  { %v842_v47 = vpack.c.bf16 %v840_v45, %v840_v45 }
 0xd4f   :  { %v855_v16 = vsel %vm1463_vm15, %v842_v47, 0 }
 0xd50   :  { %v838_v18 = vpop.f32.mrf.mxu3  ;;  %864 = vmatpush.bf16.msrb.mxu0 %v855_v16 }
 0xd53   :  { %980 = vmatmul.msk.bf16.vlgmr.msrb.gmra.mxu0 %vm1464_vm14, %v850_v39 }
 0xdd0   :  { %v866_v21 = vpop.f32.mrf.mxu0 }
 0xdd1   :  { %v871_v22 = vmul.f32 %v870_v19, %v866_v21 }
 0xdd3   :  { %v873_v14 = vsel %vm872_vm3, %v871_v22, 0.0 }
 0xdd4   :  { %874 = vadd.xlane.f32.xlu1 %v873_v14 }
 0xdd8   :  { %v868_v23 = vpop.f32.mrf.mxu0 }
 0xe47   :  { %v875_v24 = vpop.xlane.xlu1 %874 }
 0xe48   :  { %v876_v25 = vadd.f32 %v875_v24, %v870_v19 }
 0xe4a   :  { %878 = vrot.lane.b32.xlu2 %v876_v25, %s1161_s2 }
 0xea4   :  { %v879_v57 = vpop.permute.xlu2 %878 }
 0xea5   :  { %882 = vst.msk [vmem:[%s1419_s4] sm:$0x3] %vm881_vm7, %v879_v57 }
 0xea6   :  { %887 = vsyncpa [#allocation3], 1 }
 0xea7   :  { %888 = vsyncpa [#allocation5], 1 }
 0xea8   :  { %889 = vsyncpa [#allocation8], 1 }

</bundles_post_ra>
